<compile_context>
chip_gen: v7x
topology: tpu7x:2x2x1
jax: 0.10.0
libtpu: 0.0.40
codegen_flags: <defaults>
</compile_context>

<pallas_src>
import functools

import jax
import jax.numpy as jnp
from jax.experimental import pallas as pl
from jax.experimental.pallas import tpu as pltpu


_TILE_ROWS = 512   # sublane-axis tile (multiple of 8); 512 on all generations
_TILE_COLS = 512   # lane-axis tile (multiple of 128)
# VMEM per grid step: (3 ch + 1 out) * 512*512*4B * 2 buffers = 8 MiB
# -> fits scoped-VMEM defaults: v5e 16 MiB, v6e 32 MiB, v7x 32 MiB.


def _round_up(x, m):
    return ((x + m - 1) // m) * m


def _linear_softplus_kernel(wb_ref, x_ref, o_ref):
    # wb_ref: (4,) f32 in SMEM -> [w0, w1, w2, b]
    # x_ref : (3, tile_rows, _TILE_COLS) f32 VMEM tile (channel-major, lane-dense)
    # o_ref : (tile_rows, _TILE_COLS) f32 VMEM tile
    w0 = wb_ref[0]
    w1 = wb_ref[1]
    w2 = wb_ref[2]
    b = wb_ref[3]
    # Linear(3 -> 1) as a 3-term VPU FMA (no MXU).
    z = x_ref[0] * w0 + x_ref[1] * w1 + x_ref[2] * w2 + b
    # softplus(z) = max(z, 0) + log1p(exp(-|z|))  (numerically stable)
    o_ref[...] = jnp.maximum(z, 0.0) + jnp.log1p(jnp.exp(-jnp.abs(z)))


@functools.partial(jax.jit, static_argnames=())
def linear_decision_network(features, weight, bias):
    """features: (..., 3); weight: (1, 3); bias: (1,) -> (prod(batch dims),) f32.

    Matches F.softplus(nn.Linear(3, 1)(features)).view(-1).
    """
    feat2d = features.reshape(-1, features.shape[-1]).astype(jnp.float32)  # (N, 3)
    n = feat2d.shape[0]
    cols = _TILE_COLS

    # Row/tile geometry: pad rows to a multiple of 8 (small N) or _TILE_ROWS (large N).
    rows_needed = pl.cdiv(n, cols)
    tile_rows = min(_TILE_ROWS, _round_up(rows_needed, 8))
    rows = _round_up(rows_needed, tile_rows)
    n_pad = rows * cols

    # Channel-major, lane-dense re-layout in ONE fused transpose+pad pass, then a free
    # reshape to (3, rows, cols).  Padding is zeros -> softplus(bias), sliced off below.
    feat_cm = jnp.pad(feat2d.T, ((0, 0), (0, n_pad - n)))          # (3, n_pad)
    x = feat_cm.reshape(3, rows, cols)                              # (3, rows, cols)

    # Weight (3 scalars) + bias packed into one tiny SMEM-resident array.
    wb = jnp.concatenate(
        [weight.astype(jnp.float32).reshape(-1),
         bias.astype(jnp.float32).reshape(-1)]
    )  # (4,)

    grid = (rows // tile_rows,)

    cost = pl.CostEstimate(
        flops=7 * n_pad,             # 3 mul + 3 add + max per output element
        transcendentals=2 * n_pad,   # exp + log1p per output element
        bytes_accessed=16 * n_pad,   # 3*4B read + 4B write per output element
    )

    out = pl.pallas_call(
        _linear_softplus_kernel,
        out_shape=jax.ShapeDtypeStruct((rows, cols), jnp.float32),
        grid_spec=pltpu.PrefetchScalarGridSpec(
            num_scalar_prefetch=0,
            grid=grid,
            in_specs=[
                pl.BlockSpec(memory_space=pltpu.MemorySpace.SMEM),        # [w0,w1,w2,b]
                pl.BlockSpec((3, tile_rows, cols), lambda i: (0, i, 0)),  # stacked chans
            ],
            out_specs=pl.BlockSpec((tile_rows, cols), lambda i: (i, 0)),
        ),
        compiler_params=pltpu.CompilerParams(
            dimension_semantics=("parallel",)),
        cost_estimate=cost,
    )(wb, x)

    return out.reshape(-1)[:n]  # un-pad; matches .view(-1)


if __name__ == "__main__":
    key = jax.random.PRNGKey(0)
    k_x, k_w, k_b = jax.random.split(key, 3)

    # Small deterministic example: a (4, 8) batch of 3-d feature vectors.
    features = jax.random.normal(k_x, (4, 8, 3), dtype=jnp.float32)

    # Deterministic "init" mimicking nn.Linear(3, 1): U(-1/sqrt(3), 1/sqrt(3)).
    bound = 1.0 / jnp.sqrt(3.0)
    weight = jax.random.uniform(k_w, (1, 3), minval=-bound, maxval=bound,
                                dtype=jnp.float32)
    bias = jax.random.uniform(k_b, (1,), minval=-bound, maxval=bound,
                              dtype=jnp.float32)

    out = linear_decision_network(features, weight, bias)
    out = jax.block_until_ready(out)

    # Reference in plain JAX (same math as F.softplus(linear(x)).view(-1)).
    ref_z = features @ weight.T + bias                       # (4, 8, 1)
    ref = (jnp.maximum(ref_z, 0.0) + jnp.log1p(jnp.exp(-jnp.abs(ref_z)))).reshape(-1)
    assert out.shape == (4 * 8,)
    assert jnp.allclose(out, ref, atol=1e-5, rtol=1e-5)

    print("KERNEL_OK")
</pallas_src>

<mosaic_0001>
module attributes {stable_mosaic.version = 11 : i64} {
  func.func @_linear_softplus_kernel(%arg0: i32, %arg1: memref<4xf32, #tpu.memory_space<smem>>, %arg2: memref<3x8x512xf32, #tpu.memory_space<vmem>>, %arg3: memref<8x512xf32, #tpu.memory_space<vmem>>) attributes {dimension_semantics = [#tpu.dimension_semantics<parallel>], iteration_bounds = array<i64: 1>, scalar_prefetch = 0 : i64, scratch_operands = 0 : i64, tpu.core_type = #tpu.core_type<tc>, window_params = [{transform_indices = @transform_0, window_bounds = array<i64: 4>}, {transform_indices = @transform_1, window_bounds = array<i64: 3, 8, 512>}, {transform_indices = @transform_2, window_bounds = array<i64: 8, 512>}]} {
    %c0 = arith.constant 0 : index
    %0 = memref.load %arg1[%c0] : memref<4xf32, #tpu.memory_space<smem>>
    %c1 = arith.constant 1 : index
    %1 = memref.load %arg1[%c1] : memref<4xf32, #tpu.memory_space<smem>>
    %c2 = arith.constant 2 : index
    %2 = memref.load %arg1[%c2] : memref<4xf32, #tpu.memory_space<smem>>
    %c3 = arith.constant 3 : index
    %3 = memref.load %arg1[%c3] : memref<4xf32, #tpu.memory_space<smem>>
    %c0_0 = arith.constant 0 : index
    %c0_1 = arith.constant 0 : index
    %c0_2 = arith.constant 0 : index
    %4 = vector.load %arg2[%c0_0, %c0_1, %c0_2] : memref<3x8x512xf32, #tpu.memory_space<vmem>>, vector<1x8x512xf32>
    %5 = vector.shape_cast %4 : vector<1x8x512xf32> to vector<8x512xf32>
    %6 = vector.broadcast %0 : f32 to vector<8x512xf32>
    %7 = arith.mulf %5, %6 : vector<8x512xf32>
    %c1_3 = arith.constant 1 : index
    %c0_4 = arith.constant 0 : index
    %c0_5 = arith.constant 0 : index
    %8 = vector.load %arg2[%c1_3, %c0_4, %c0_5] : memref<3x8x512xf32, #tpu.memory_space<vmem>>, vector<1x8x512xf32>
    %9 = vector.shape_cast %8 : vector<1x8x512xf32> to vector<8x512xf32>
    %10 = vector.broadcast %1 : f32 to vector<8x512xf32>
    %11 = arith.mulf %9, %10 : vector<8x512xf32>
    %12 = arith.addf %7, %11 : vector<8x512xf32>
    %c2_6 = arith.constant 2 : index
    %c0_7 = arith.constant 0 : index
    %c0_8 = arith.constant 0 : index
    %13 = vector.load %arg2[%c2_6, %c0_7, %c0_8] : memref<3x8x512xf32, #tpu.memory_space<vmem>>, vector<1x8x512xf32>
    %14 = vector.shape_cast %13 : vector<1x8x512xf32> to vector<8x512xf32>
    %15 = vector.broadcast %2 : f32 to vector<8x512xf32>
    %16 = arith.mulf %14, %15 : vector<8x512xf32>
    %17 = arith.addf %12, %16 : vector<8x512xf32>
    %18 = vector.broadcast %3 : f32 to vector<8x512xf32>
    %19 = arith.addf %17, %18 : vector<8x512xf32>
    %cst = arith.constant 0.000000e+00 : f32
    %20 = vector.broadcast %cst : f32 to vector<8x512xf32>
    %21 = arith.maximumf %19, %20 : vector<8x512xf32>
    %22 = math.absf %19 : vector<8x512xf32>
    %cst_9 = arith.constant 0.000000e+00 : f32
    %23 = vector.broadcast %cst_9 : f32 to vector<8x512xf32>
    %24 = arith.subf %23, %22 : vector<8x512xf32>
    %25 = math.exp %24 : vector<8x512xf32>
    %26 = math.log1p %25 : vector<8x512xf32>
    %27 = arith.addf %21, %26 : vector<8x512xf32>
    %c0_10 = arith.constant 0 : index
    %c0_11 = arith.constant 0 : index
    %28 = vector.load %arg3[%c0_10, %c0_11] : memref<8x512xf32, #tpu.memory_space<vmem>>, vector<8x512xf32>
    tpu.vector_store %arg3[%c0_10, %c0_11], %27 {strides = array<i32>} : memref<8x512xf32, #tpu.memory_space<vmem>>, vector<8x512xf32>,
    return
  }
  func.func @transform_0(%arg0: i32) -> i32 {
    %c0_i32 = arith.constant 0 : i32
    %c0_i32_0 = arith.constant 0 : i32
    return %c0_i32 : i32
  }
  func.func @transform_1(%arg0: i32) -> (i32, i32, i32) {
    %c0_i32 = arith.constant 0 : i32
    %c0_i32_0 = arith.constant 0 : i32
    %c0_i32_1 = arith.constant 0 : i32
    return %c0_i32, %arg0, %c0_i32_0 : i32, i32, i32
  }
  func.func @transform_2(%arg0: i32) -> (i32, i32) {
    %c0_i32 = arith.constant 0 : i32
    %c0_i32_0 = arith.constant 0 : i32
    return %arg0, %c0_i32 : i32, i32
  }
}

</mosaic_0001>

<bundles_post_ra>
// kernel: linear_decision_network.1
= control target key start
LH: loop header
LB: loop body
LE: loop exit
PB: predicated region body
PF: predicated region fallthrough
CT: control target
= control target key end

     0   :  { %7 = vsyncpa [#allocation3], 0  ;;  %s270_s0 = inlined_call_operand.vmem [shape: f32[4], index: 0, kind: input, shape index: {}]   ;;  %s271_s1 = inlined_call_operand.vmem [shape: f32[3,8,512], index: 1, kind: input, shape index: {}]   ;;  %s272_s2 = inlined_call_operand.vmem [shape: f32[8,512], index: 2, kind: output, shape index: {}]  }
   0x1   :  { %s14_s11 = sshll.u32 %s270_s0, 4  ;;  %s15_s11 = int_to_ptr.vmem [resolvable:$true] %s14_s11 }
   0x2   :  { %s167_s12 = scalar_lea.vmem %s15_s11, 16  ;;  %p172_p1 = scmp.lt.s32.totalorder %s15_s11, %s15_s11 }
   0x3   :  { %p168_p0 = scmp.ne.s32.totalorder %s15_s11, %s167_s12  ;;  %p173_p2 = scmp.lt.s32.totalorder %s167_s12, %s167_s12 }
   0x5   :  { %p174_p3 = por %p173_p2, %p172_p1 }
   0x7   :  { %p175_p4 = pnand %p174_p3, %p168_p0 }
   0x9   :  { %178 = shalt.err (!%p175_p4)
}
   0xa   :  { %s181_s13 = smov [#allocation2]  }
   0xb   :  { %17 = dma.vmem_to_smem %s15_s11, 16, %s181_s13, [#allocation3]  }
   0xc   :  { %179 = dma.done.wait [#allocation3], 16  }
   0xd   :  { %180 = vsyncadd [#allocation3], 4294967280 }
   0xe   :  { %23 = sfence }
   0xf   :  { %s24_s14 = sld [smem:[#allocation2]]  ;;  %s139_s15 = sld [smem:[#allocation2 + $0x1]]  ;;  %v28_v0 = vld [vmem:[%s271_s1] sm:$0xff]  ;;  %v29_v3 = vld [vmem:[%s271_s1 + $0x8] sm:$0xff]  ;;  %v30_v6 = vld [vmem:[%s271_s1 + $0x10] sm:$0xff] }
  0x10   :  { %s140_s16 = sld [smem:[#allocation2 + $0x2]]  ;;  %s141_s17 = sld [smem:[#allocation2 + $0x3]]  ;;  %v142_v1 = vld [vmem:[%s271_s1 + $0x20] sm:$0xff]  ;;  %v143_v4 = vld [vmem:[%s271_s1 + $0x28] sm:$0xff]  ;;  %v144_v7 = vld [vmem:[%s271_s1 + $0x30] sm:$0xff] }
  0x11   :  { %v146_v2 = vld [vmem:[%s271_s1 + $0x40] sm:$0xff]  ;;  %v147_v5 = vld [vmem:[%s271_s1 + $0x48] sm:$0xff]  ;;  %v148_v10 = vld [vmem:[%s271_s1 + $0x50] sm:$0xff] }
  0x12   :  { %v31_v11 = vld [vmem:[%s271_s1 + $0x18] sm:$0xff] }
  0x13   :  { %v145_v16 = vld [vmem:[%s271_s1 + $0x38] sm:$0xff] }
  0x14   :  { %v149_v17 = vld [vmem:[%s271_s1 + $0x58] sm:$0xff] }
  0x15   :  { %v32_v8 = vstv %s24_s14  ;;  %v42_v9 = vstv %s139_s15 }
  0x16   :  { %v33_v12 = vmul.f32 %v32_v8, %v28_v0  ;;  %v43_v13 = vmul.f32 %v142_v1, %v42_v9  ;;  %v56_v14 = vstv %s140_s16  ;;  %v65_v15 = vstv %s141_s17 }
  0x17   :  { %v57_v18 = vmul.f32 %v146_v2, %v56_v14  ;;  %v34_v19 = vmul.f32 %v32_v8, %v29_v3  ;;  %v44_v20 = vmul.f32 %v143_v4, %v42_v9  ;;  %v58_v21 = vmul.f32 %v147_v5, %v56_v14 }
  0x18   :  { %v47_v22 = vadd.f32 %v43_v13, %v33_v12  ;;  %v35_v23 = vmul.f32 %v32_v8, %v30_v6  ;;  %v45_v24 = vmul.f32 %v144_v7, %v42_v9  ;;  %v59_v25 = vmul.f32 %v148_v10, %v56_v14 }
  0x19   :  { %v48_v26 = vadd.f32 %v44_v20, %v34_v19  ;;  %v36_v27 = vmul.f32 %v32_v8, %v31_v11  ;;  %v46_v28 = vmul.f32 %v145_v16, %v42_v9  ;;  %v60_v29 = vmul.f32 %v149_v17, %v56_v14 }
  0x1a   :  { %v61_v30 = vadd.f32 %v57_v18, %v47_v22  ;;  %v49_v31 = vadd.f32 %v45_v24, %v35_v23 }
  0x1b   :  { %v62_v32 = vadd.f32 %v58_v21, %v48_v26  ;;  %v50_v33 = vadd.f32 %v46_v28, %v36_v27 }
  0x1c   :  { %v236_v34 = vadd.f32 %v65_v15, %v61_v30  ;;  %v63_v35 = vadd.f32 %v59_v25, %v49_v31 }
  0x1d   :  { %v238_v36 = vadd.f32 %v65_v15, %v62_v32  ;;  %v64_v37 = vadd.f32 %v60_v29, %v50_v33 }
  0x1e   :  { %v74_v38 = vand.u32 2147483647, %v236_v34  ;;  %v241_v39 = vadd.f32 %v65_v15, %v63_v35  ;;  %v70_v9 = vmax.f32 %v236_v34, 0.0 }
  0x1f   :  { %v75_v40 = vand.u32 2147483647, %v238_v36  ;;  %v244_v41 = vadd.f32 %v65_v15, %v64_v37  ;;  %v71_v15 = vmax.f32 %v238_v36, 0.0 }
  0x20   :  { %v78_v42 = vsub.f32 0.0, %v74_v38  ;;  %v76_v43 = vand.u32 2147483647, %v241_v39  ;;  %v72_v19 = vmax.f32 %v241_v39, 0.0 }
  0x21   :  { %v79_v44 = vsub.f32 0.0, %v75_v40  ;;  %v77_v45 = vand.u32 2147483647, %v244_v41  ;;  %v73_v26 = vmax.f32 %v244_v41, 0.0 }
  0x22   :  { %v82_v46 = vmul.f32 1.442695, %v78_v42  ;;  %v80_v47 = vsub.f32 0.0, %v76_v43 }
  0x23   :  { %v84_v48 = vmul.f32 1.442695, %v79_v44  ;;  %v81_v49 = vsub.f32 0.0, %v77_v45 }
  0x24   :  { %151 = vpow2.f32 %v82_v46  ;;  %v86_v50 = vmul.f32 1.442695, %v80_v47 }
  0x25   :  { %153 = vpow2.f32 %v84_v48  ;;  %v88_v51 = vmul.f32 1.442695, %v81_v49 }
  0x26   :  { %155 = vpow2.f32 %v86_v50 }
  0x27   :  { %157 = vpow2.f32 %v88_v51 }
  0x2e   :  { %v152_v52 = vpop.eup %151 }
  0x2f   :  { %v154_v53 = vpop.eup %153  ;;  %v90_v54 = vadd.f32 1.0, %v152_v52  ;;  %v93_v59 = vmul.f32 -0.5, %v152_v52  ;;  %v96_v1 = vand.u32 2147483647, %v152_v52 }
  0x30   :  { %v156_v55 = vpop.eup %155  ;;  %v99_v56 = vadd.f32 1.0, %v154_v53  ;;  %v102_v60 = vmul.f32 -0.5, %v154_v53  ;;  %v105_v3 = vand.u32 2147483647, %v154_v53 }
  0x31   :  { %v158_v57 = vpop.eup %157  ;;  %159 = vlog2.f32 %v90_v54  ;;  %v108_v58 = vadd.f32 1.0, %v156_v55  ;;  %v111_v62 = vmul.f32 -0.5, %v156_v55  ;;  %v94_v63 = vadd.f32 1.0, %v93_v59 }
  0x32   :  { %161 = vlog2.f32 %v99_v56  ;;  %v117_v61 = vadd.f32 1.0, %v158_v57  ;;  %v120_v0 = vmul.f32 -0.5, %v158_v57  ;;  %v103_v2 = vadd.f32 1.0, %v102_v60 }
  0x33   :  { %163 = vlog2.f32 %v108_v58  ;;  %v112_v4 = vadd.f32 1.0, %v111_v62  ;;  %v114_v5 = vand.u32 2147483647, %v156_v55  ;;  %v95_v6 = vmul.f32 %v152_v52, %v94_v63 }
  0x34   :  { %165 = vlog2.f32 %v117_v61  ;;  %v121_v7 = vadd.f32 1.0, %v120_v0  ;;  %vm249_vm0 = vcmp.lt.f32.partialorder %v96_v1, 0.0004427343  ;;  %v104_v11 = vmul.f32 %v154_v53, %v103_v2 }
  0x35   :  { %v123_v12 = vand.u32 2147483647, %v158_v57  ;;  %vm106_vm1 = vcmp.lt.f32.partialorder %v105_v3, 0.0004427343  ;;  %v113_v16 = vmul.f32 %v156_v55, %v112_v4  ;;  %vm115_vm2 = vcmp.lt.f32.partialorder %v114_v5, 0.0004427343 }
  0x36   :  { %v122_v22 = vmul.f32 %v158_v57, %v121_v7 }
  0x37   :  { %vm124_vm3 = vcmp.lt.f32.partialorder %v123_v12, 0.0004427343 }
  0x3b   :  { %v160_v8 = vpop.eup %159 }
  0x3c   :  { %v162_v13 = vpop.eup %161  ;;  %v92_v14 = vmul.f32 0.6931472, %v160_v8 }
  0x3d   :  { %v164_v17 = vpop.eup %163  ;;  %v101_v18 = vmul.f32 0.6931472, %v162_v13 }
  0x3e   :  { %v98_v20 = vsel %vm249_vm0, %v95_v6, %v92_v14  ;;  %v110_v21 = vmul.f32 0.6931472, %v164_v17  ;;  %v166_v23 = vpop.eup %165 }
  0x3f   :  { %v126_v24 = vadd.f32 %v98_v20, %v70_v9  ;;  %v107_v25 = vsel %vm106_vm1, %v104_v11, %v101_v18  ;;  %v119_v29 = vmul.f32 0.6931472, %v166_v23 }
  0x40   :  { %v127_v27 = vadd.f32 %v107_v25, %v71_v15  ;;  %v116_v28 = vsel %vm115_vm2, %v113_v16, %v110_v21 }
  0x41   :  { %130 = vst [vmem:[%s272_s2] sm:$0xff] %v126_v24  ;;  %v128_v30 = vadd.f32 %v116_v28, %v72_v19  ;;  %v125_v31 = vsel %vm124_vm3, %v122_v22, %v119_v29 }
  0x42   :  { %131 = vst [vmem:[%s272_s2 + $0x8] sm:$0xff] %v127_v27  ;;  %v129_v32 = vadd.f32 %v125_v31, %v73_v26 }
  0x43   :  { %132 = vst [vmem:[%s272_s2 + $0x10] sm:$0xff] %v128_v30 }
  0x44   :  { %133 = vst [vmem:[%s272_s2 + $0x18] sm:$0xff] %v129_v32 }
  0x45   :  { %138 = vsyncpa [#allocation3], 1 }

</bundles_post_ra>
